<compile_context>
chip_gen: v6e
topology: v6e:2x2x1
jax: 0.10.0
libtpu: 0.0.40
codegen_flags: <defaults>
</compile_context>

<pallas_src>
import functools

import jax
import jax.numpy as jnp
from jax.experimental import pallas as pl
from jax.experimental.pallas import tpu as pltpu

# Module hyper-parameters (defaults of ConvBlock1d)
IN_CHANNELS = 16
OUT_CHANNELS = 32
KERNEL_SIZE = 3
STRIDE = 1          # only stride=1 implemented (module default)
PADDING = 1
DILATION = 1        # only dilation=1 implemented (module default)
NUM_GROUPS = 8
GN_EPS = 1e-5       # PyTorch GroupNorm default eps

MAX_BATCH_TILE = 8  # samples fused per grid step (keep >=2 grid steps on v7x for 2 TCs)


def _round_up(v, m):
    return (v + m - 1) // m * m


def _conv_block1d_kernel(x_ref, ab_ref, g_ref, gt_ref, w_ref, b_ref, o_ref, *,
                         eps, length, kernel_size, padding):
    # x_ref : (B_tile, C_in, Lp)  zero-padded activations (f32)
    # ab_ref: (B_tile, 2, C_in)   folded affine: a = gamma*(scale+1), b = beta*(scale+1)+shift
    # g_ref : (C_in, G)           one-hot channel->group map (f32)
    # gt_ref: (G, C_in)           its transpose
    # w_ref : (C_out, K*C_in)     conv weight, k-major im2col layout (bf16)
    # b_ref : (C_out, 1)          conv bias (f32)
    # o_ref : (B_tile, C_out, Lp)
    x = x_ref[...].astype(jnp.float32)
    bt, c_in, lp = x.shape
    n_groups = g_ref.shape[1]
    inv_n = 1.0 / float((c_in // n_groups) * length)

    # ---- GroupNorm statistics: single pass (sum & sum-of-squares) ----
    # Padded lanes (>= length) are zero, so plain full-lane sums are exact.
    gmap = g_ref[...]                                   # (C_in, G)
    gmap_t = gt_ref[...]                                # (G, C_in)
    ch_sum = jnp.sum(x, axis=2)                         # (B, C_in)
    ch_sq = jnp.sum(x * x, axis=2)                      # (B, C_in)
    g_mean = jnp.dot(ch_sum, gmap, preferred_element_type=jnp.float32) * inv_n   # (B, G)
    g_ex2 = jnp.dot(ch_sq, gmap, preferred_element_type=jnp.float32) * inv_n     # (B, G)
    g_var = jnp.maximum(g_ex2 - g_mean * g_mean, 0.0)
    g_rstd = jax.lax.rsqrt(g_var + eps)                 # (B, G)
    mean_c = jnp.dot(g_mean, gmap_t, preferred_element_type=jnp.float32)  # (B, C_in)
    rstd_c = jnp.dot(g_rstd, gmap_t, preferred_element_type=jnp.float32)  # (B, C_in)

    # ---- normalize + GN affine + FiLM, folded into one per-channel scale/offset ----
    ab = ab_ref[...]                                    # (B, 2, C_in)
    a = ab[:, 0, :]
    b = ab[:, 1, :]
    sc = rstd_c * a                                     # (B, C_in)
    off = b - mean_c * sc
    y = x * sc[:, :, None] + off[:, :, None]            # (B, C_in, Lp)

    # ---- SiLU ----
    y = y * jax.nn.sigmoid(y)

    # ---- zero the padded tail so the shifted conv taps see true zero padding ----
    col = jax.lax.broadcasted_iota(jnp.int32, (1, 1, lp), 2)
    y = y * (col < length).astype(jnp.float32)
    y = y.astype(jnp.bfloat16)                          # bf16 operands for the MXU

    # ---- Conv1d as one depth-(K*C_in) im2col matmul per sample ----
    w = w_ref[...]                                      # (C_out, K*C_in) bf16
    bias = b_ref[...]                                   # (C_out, 1) f32
    for i in range(bt):                                 # static unroll, B_tile small
        yi = y[i]                                       # (C_in, Lp)
        views = []
        for k in range(kernel_size):
            s = k - padding                             # tap: output col l reads y[:, l + s]
            if s == 0:
                views.append(yi)
            elif s > 0:
                views.append(jnp.concatenate(
                    [yi[:, s:], jnp.zeros((c_in, s), jnp.bfloat16)], axis=1))
            else:
                views.append(jnp.concatenate(
                    [jnp.zeros((c_in, -s), jnp.bfloat16), yi[:, :lp + s]], axis=1))
        xi = jnp.concatenate(views, axis=0)             # (K*C_in, Lp)
        res = jnp.dot(w, xi, preferred_element_type=jnp.float32)   # (C_out, Lp) f32
        o_ref[i] = (res + bias).astype(o_ref.dtype)


@jax.jit
def conv_block1d(x, gamma, beta, weight, bias, scale=None, shift=None):
    if STRIDE != 1 or DILATION != 1:
        raise NotImplementedError("only stride=1, dilation=1 are implemented")
    N, C_in, L = x.shape
    C_out, C_in_w, K = weight.shape
    assert C_in_w == C_in and C_in % NUM_GROUPS == 0

    L_out = L + 2 * PADDING - (K - 1)
    # lane-dense padded length, with headroom for the shifted conv taps
    Lp = _round_up(max(L, L_out) + K + PADDING, 128)
    B_tile = min(MAX_BATCH_TILE, N)
    N_pad = _round_up(N, B_tile)

    x_p = jnp.pad(x.astype(jnp.float32), ((0, N_pad - N), (0, 0), (0, Lp - L)))

    # Fold GroupNorm affine and FiLM into one per-sample (a, b):
    #   y = (gamma*xn + beta)*(scale+1) + shift = a*xn + b
    gamma = jnp.reshape(gamma, (C_in,)).astype(jnp.float32)
    beta = jnp.reshape(beta, (C_in,)).astype(jnp.float32)
    if scale is not None:
        s1 = jnp.reshape(scale, (N, C_in)).astype(jnp.float32) + 1.0
        sh = jnp.reshape(shift, (N, C_in)).astype(jnp.float32)
        a = gamma[None, :] * s1
        b = beta[None, :] * s1 + sh
    else:
        a = jnp.broadcast_to(gamma[None, :], (N, C_in))
        b = jnp.broadcast_to(beta[None, :], (N, C_in))
    ab = jnp.stack([a, b], axis=1)                       # (N, 2, C_in)
    ab = jnp.pad(ab, ((0, N_pad - N), (0, 0), (0, 0)))

    # one-hot channel -> group map (for reshape-free GroupNorm reductions)
    cpg = C_in // NUM_GROUPS
    gmap = (jnp.arange(C_in)[:, None] // cpg
            == jnp.arange(NUM_GROUPS)[None, :]).astype(jnp.float32)   # (C_in, G)
    gmap_t = gmap.T                                      # (G, C_in)

    # im2col weight layout (k-major to match the stacked views) + bf16 pre-cast
    w2 = jnp.transpose(weight, (0, 2, 1)).reshape(C_out, K * C_in).astype(jnp.bfloat16)
    b2 = jnp.reshape(bias, (C_out, 1)).astype(jnp.float32)

    kernel = functools.partial(_conv_block1d_kernel, eps=GN_EPS, length=L,
                               kernel_size=K, padding=PADDING)
    out = pl.pallas_call(
        kernel,
        out_shape=jax.ShapeDtypeStruct((N_pad, C_out, Lp), x.dtype),
        grid_spec=pltpu.PrefetchScalarGridSpec(
            num_scalar_prefetch=0,
            grid=(N_pad // B_tile,),
            in_specs=[
                pl.BlockSpec((B_tile, C_in, Lp), lambda n: (n, 0, 0)),      # x
                pl.BlockSpec((B_tile, 2, C_in), lambda n: (n, 0, 0)),       # folded (a, b)
                pl.BlockSpec((C_in, NUM_GROUPS), lambda n: (0, 0)),         # group map
                pl.BlockSpec((NUM_GROUPS, C_in), lambda n: (0, 0)),         # group map^T
                pl.BlockSpec((C_out, K * C_in), lambda n: (0, 0)),          # im2col weight
                pl.BlockSpec((C_out, 1), lambda n: (0, 0)),                 # bias
            ],
            out_specs=pl.BlockSpec((B_tile, C_out, Lp), lambda n: (n, 0, 0)),
        ),
        compiler_params=pltpu.CompilerParams(
            dimension_semantics=("parallel",),
        ),
    )(x_p, ab, gmap, gmap_t, w2, b2)
    return out[:N, :, :L_out]


def _reference(x, gamma, beta, weight, bias, scale, shift):
    """Pure-JAX reference of ConvBlock1d.forward (f32 everywhere)."""
    N, C_in, L = x.shape
    xg = x.reshape(N, NUM_GROUPS, -1)
    mean = xg.mean(axis=2, keepdims=True)
    var = xg.var(axis=2, keepdims=True)                  # biased, like PyTorch
    xn = ((xg - mean) / jnp.sqrt(var + GN_EPS)).reshape(N, C_in, L)
    xn = xn * gamma[None, :, None] + beta[None, :, None]
    if scale is not None:
        xn = xn * (scale + 1.0) + shift
    act = xn * jax.nn.sigmoid(xn)
    out = jax.lax.conv_general_dilated(
        act, weight, window_strides=(STRIDE,), padding=[(PADDING, PADDING)],
        rhs_dilation=(DILATION,), dimension_numbers=("NCH", "OIH", "NCH"))
    return out + bias[None, :, None]


if __name__ == "__main__":
    key = jax.random.PRNGKey(0)
    k_x, k_w, k_b, k_g, k_bt, k_s, k_sh = jax.random.split(key, 7)

    N, L = 2, 64
    x = jax.random.normal(k_x, (N, IN_CHANNELS, L), dtype=jnp.float32)

    # Parameters in their natural PyTorch shapes.
    gamma = 1.0 + 0.1 * jax.random.normal(k_g, (IN_CHANNELS,), dtype=jnp.float32)
    beta = 0.1 * jax.random.normal(k_bt, (IN_CHANNELS,), dtype=jnp.float32)
    weight = 0.1 * jax.random.normal(
        k_w, (OUT_CHANNELS, IN_CHANNELS, KERNEL_SIZE), dtype=jnp.float32)
    bias = 0.1 * jax.random.normal(k_b, (OUT_CHANNELS,), dtype=jnp.float32)

    # Optional FiLM scale/shift path exercised with real values.
    scale = 0.1 * jax.random.normal(k_s, (N, IN_CHANNELS, 1), dtype=jnp.float32)
    shift = 0.1 * jax.random.normal(k_sh, (N, IN_CHANNELS, 1), dtype=jnp.float32)

    out = conv_block1d(x, gamma, beta, weight, bias, scale, shift)
    out = jax.block_until_ready(out)
    assert out.shape == (N, OUT_CHANNELS, L)

    ref = _reference(x, gamma, beta, weight, bias, scale, shift)
    err = float(jnp.max(jnp.abs(out - ref)))
    assert jnp.allclose(out, ref, atol=3e-2, rtol=3e-2), f"max abs err = {err}"

    print("KERNEL_OK")
</pallas_src>

<mosaic_0001>
module attributes {stable_mosaic.version = 11 : i64} {
  func.func @_conv_block1d_kernel(%arg0: i32, %arg1: memref<2x16x128xf32, #tpu.memory_space<vmem>>, %arg2: memref<2x2x16xf32, #tpu.memory_space<vmem>>, %arg3: memref<16x8xf32, #tpu.memory_space<vmem>>, %arg4: memref<8x16xf32, #tpu.memory_space<vmem>>, %arg5: memref<32x48xbf16, #tpu.memory_space<vmem>>, %arg6: memref<32x1xf32, #tpu.memory_space<vmem>>, %arg7: memref<2x32x128xf32, #tpu.memory_space<vmem>>) attributes {dimension_semantics = [#tpu.dimension_semantics<parallel>], iteration_bounds = array<i64: 1>, scalar_prefetch = 0 : i64, scratch_operands = 0 : i64, tpu.core_type = #tpu.core_type<tc>, window_params = [{transform_indices = @transform_0, window_bounds = array<i64: 2, 16, 128>}, {transform_indices = @transform_1, window_bounds = array<i64: 2, 2, 16>}, {pipeline_mode = #tpu.pipeline_mode<synchronous>, transform_indices = @transform_2, window_bounds = array<i64: 16, 8>}, {pipeline_mode = #tpu.pipeline_mode<synchronous>, transform_indices = @transform_3, window_bounds = array<i64: 8, 16>}, {pipeline_mode = #tpu.pipeline_mode<synchronous>, transform_indices = @transform_4, window_bounds = array<i64: 32, 48>}, {pipeline_mode = #tpu.pipeline_mode<synchronous>, transform_indices = @transform_5, window_bounds = array<i64: 32, 1>}, {transform_indices = @transform_6, window_bounds = array<i64: 2, 32, 128>}]} {
    %c0 = arith.constant 0 : index
    %c0_0 = arith.constant 0 : index
    %c0_1 = arith.constant 0 : index
    %0 = vector.load %arg1[%c0, %c0_0, %c0_1] : memref<2x16x128xf32, #tpu.memory_space<vmem>>, vector<2x16x128xf32>
    %c0_2 = arith.constant 0 : index
    %c0_3 = arith.constant 0 : index
    %1 = vector.load %arg3[%c0_2, %c0_3] : memref<16x8xf32, #tpu.memory_space<vmem>>, vector<16x8xf32>
    %c0_4 = arith.constant 0 : index
    %c0_5 = arith.constant 0 : index
    %2 = vector.load %arg4[%c0_4, %c0_5] : memref<8x16xf32, #tpu.memory_space<vmem>>, vector<8x16xf32>
    %cst = arith.constant dense<0.000000e+00> : vector<2x16xf32>
    %3 = vector.multi_reduction <add>, %0, %cst [2] : vector<2x16x128xf32> to vector<2x16xf32>
    %4 = arith.mulf %0, %0 : vector<2x16x128xf32>
    %cst_6 = arith.constant dense<0.000000e+00> : vector<2x16xf32>
    %5 = vector.multi_reduction <add>, %4, %cst_6 [2] : vector<2x16x128xf32> to vector<2x16xf32>
    %cst_7 = arith.constant dense<0.000000e+00> : vector<2x8xf32>
    %6 = tpu.matmul %3, %1, %cst_7 {dimension_numbers = #tpu.dot_dimension_numbers<[1], [0], [0], [1], [0, 0, 1, 1], [], []>} : vector<2x16xf32>, vector<16x8xf32>, vector<2x8xf32> -> vector<2x8xf32>
    %cst_8 = arith.constant 7.812500e-03 : f32
    %7 = vector.broadcast %cst_8 : f32 to vector<2x8xf32>
    %8 = arith.mulf %6, %7 : vector<2x8xf32>
    %cst_9 = arith.constant dense<0.000000e+00> : vector<2x8xf32>
    %9 = tpu.matmul %5, %1, %cst_9 {dimension_numbers = #tpu.dot_dimension_numbers<[1], [0], [0], [1], [0, 0, 1, 1], [], []>} : vector<2x16xf32>, vector<16x8xf32>, vector<2x8xf32> -> vector<2x8xf32>
    %cst_10 = arith.constant 7.812500e-03 : f32
    %10 = vector.broadcast %cst_10 : f32 to vector<2x8xf32>
    %11 = arith.mulf %9, %10 : vector<2x8xf32>
    %12 = arith.mulf %8, %8 : vector<2x8xf32>
    %13 = arith.subf %11, %12 : vector<2x8xf32>
    %cst_11 = arith.constant 0.000000e+00 : f32
    %14 = vector.broadcast %cst_11 : f32 to vector<2x8xf32>
    %15 = arith.maximumf %13, %14 : vector<2x8xf32>
    %cst_12 = arith.constant 9.99999974E-6 : f32
    %16 = vector.broadcast %cst_12 : f32 to vector<2x8xf32>
    %17 = arith.addf %15, %16 : vector<2x8xf32>
    %18 = math.rsqrt %17 : vector<2x8xf32>
    %cst_13 = arith.constant dense<0.000000e+00> : vector<2x16xf32>
    %19 = tpu.matmul %8, %2, %cst_13 {dimension_numbers = #tpu.dot_dimension_numbers<[1], [0], [0], [1], [0, 0, 1, 1], [], []>} : vector<2x8xf32>, vector<8x16xf32>, vector<2x16xf32> -> vector<2x16xf32>
    %cst_14 = arith.constant dense<0.000000e+00> : vector<2x16xf32>
    %20 = tpu.matmul %18, %2, %cst_14 {dimension_numbers = #tpu.dot_dimension_numbers<[1], [0], [0], [1], [0, 0, 1, 1], [], []>} : vector<2x8xf32>, vector<8x16xf32>, vector<2x16xf32> -> vector<2x16xf32>
    %c0_15 = arith.constant 0 : index
    %c0_16 = arith.constant 0 : index
    %c0_17 = arith.constant 0 : index
    %21 = vector.load %arg2[%c0_15, %c0_16, %c0_17] : memref<2x2x16xf32, #tpu.memory_space<vmem>>, vector<2x2x16xf32>
    %22 = vector.extract_strided_slice %21 {offsets = [0, 0, 0], sizes = [2, 1, 16], strides = [1, 1, 1]} : vector<2x2x16xf32> to vector<2x1x16xf32>
    %23 = vector.shape_cast %22 : vector<2x1x16xf32> to vector<2x16xf32>
    %24 = vector.extract_strided_slice %21 {offsets = [0, 1, 0], sizes = [2, 1, 16], strides = [1, 1, 1]} : vector<2x2x16xf32> to vector<2x1x16xf32>
    %25 = vector.shape_cast %24 : vector<2x1x16xf32> to vector<2x16xf32>
    %26 = arith.mulf %20, %23 : vector<2x16xf32>
    %27 = arith.mulf %19, %26 : vector<2x16xf32>
    %28 = arith.subf %25, %27 : vector<2x16xf32>
    %29 = vector.shape_cast %26 : vector<2x16xf32> to vector<2x16x1xf32>
    %30 = vector.broadcast %29 : vector<2x16x1xf32> to vector<2x16x128xf32>
    %31 = arith.mulf %0, %30 : vector<2x16x128xf32>
    %32 = vector.shape_cast %28 : vector<2x16xf32> to vector<2x16x1xf32>
    %33 = vector.broadcast %32 : vector<2x16x1xf32> to vector<2x16x128xf32>
    %34 = arith.addf %31, %33 : vector<2x16x128xf32>
    %35 = arith.negf %34 : vector<2x16x128xf32>
    %36 = math.exp %35 : vector<2x16x128xf32>
    %cst_18 = arith.constant 1.000000e+00 : f32
    %37 = vector.broadcast %cst_18 : f32 to vector<2x16x128xf32>
    %38 = arith.addf %37, %36 : vector<2x16x128xf32>
    %39 = arith.divf %37, %38 : vector<2x16x128xf32>
    %40 = arith.mulf %34, %39 : vector<2x16x128xf32>
    %41 = tpu.iota {dimensions = array<i32: 2>} : vector<1x1x128xi32>
    %c64_i32 = arith.constant 64 : i32
    %42 = vector.broadcast %c64_i32 : i32 to vector<1x1x128xi32>
    %43 = arith.cmpi slt, %41, %42 : vector<1x1x128xi32>
    %44 = arith.extui %43 : vector<1x1x128xi1> to vector<1x1x128xi32>
    %45 = arith.sitofp %44 : vector<1x1x128xi32> to vector<1x1x128xf32>
    %46 = vector.broadcast %45 : vector<1x1x128xf32> to vector<2x16x128xf32>
    %47 = arith.mulf %40, %46 : vector<2x16x128xf32>
    %48 = arith.truncf %47 : vector<2x16x128xf32> to vector<2x16x128xbf16>
    %c0_19 = arith.constant 0 : index
    %c0_20 = arith.constant 0 : index
    %49 = vector.load %arg5[%c0_19, %c0_20] : memref<32x48xbf16, #tpu.memory_space<vmem>>, vector<32x48xbf16>
    %c0_21 = arith.constant 0 : index
    %c0_22 = arith.constant 0 : index
    %50 = vector.load %arg6[%c0_21, %c0_22] : memref<32x1xf32, #tpu.memory_space<vmem>>, vector<32x1xf32>
    %51 = vector.extract_strided_slice %48 {offsets = [0, 0, 0], sizes = [1, 16, 128], strides = [1, 1, 1]} : vector<2x16x128xbf16> to vector<1x16x128xbf16>
    %52 = vector.shape_cast %51 : vector<1x16x128xbf16> to vector<16x128xbf16>
    %cst_23 = arith.constant 0.000000e+00 : bf16
    %53 = vector.broadcast %cst_23 : bf16 to vector<16x1xbf16>
    %54 = vector.extract_strided_slice %52 {offsets = [0, 0], sizes = [16, 127], strides = [1, 1]} : vector<16x128xbf16> to vector<16x127xbf16>
    %55 = tpu.concatenate %53, %54 in 1 : vector<16x1xbf16>, vector<16x127xbf16> -> vector<16x128xbf16>
    %56 = vector.extract_strided_slice %52 {offsets = [0, 1], sizes = [16, 127], strides = [1, 1]} : vector<16x128xbf16> to vector<16x127xbf16>
    %cst_24 = arith.constant 0.000000e+00 : bf16
    %57 = vector.broadcast %cst_24 : bf16 to vector<16x1xbf16>
    %58 = tpu.concatenate %56, %57 in 1 : vector<16x127xbf16>, vector<16x1xbf16> -> vector<16x128xbf16>
    %59 = tpu.concatenate %55, %52, %58 in 0 : vector<16x128xbf16>, vector<16x128xbf16>, vector<16x128xbf16> -> vector<48x128xbf16>
    %cst_25 = arith.constant dense<0.000000e+00> : vector<32x128xf32>
    %60 = tpu.matmul %49, %59, %cst_25 {dimension_numbers = #tpu.dot_dimension_numbers<[1], [0], [0], [1], [0, 0, 1, 1], [], []>} : vector<32x48xbf16>, vector<48x128xbf16>, vector<32x128xf32> -> vector<32x128xf32>
    %61 = vector.broadcast %50 : vector<32x1xf32> to vector<32x128xf32>
    %62 = arith.addf %60, %61 : vector<32x128xf32>
    %c0_26 = arith.constant 0 : index
    %c0_27 = arith.constant 0 : index
    %c0_28 = arith.constant 0 : index
    %63 = vector.load %arg7[%c0_26, %c0_27, %c0_28] : memref<2x32x128xf32, #tpu.memory_space<vmem>>, vector<1x32x128xf32>
    %64 = vector.shape_cast %63 : vector<1x32x128xf32> to vector<32x128xf32>
    %65 = vector.shape_cast %62 : vector<32x128xf32> to vector<1x32x128xf32>
    tpu.vector_store %arg7[%c0_26, %c0_27, %c0_28], %65 {strides = array<i32>} : memref<2x32x128xf32, #tpu.memory_space<vmem>>, vector<1x32x128xf32>,
    %66 = vector.extract_strided_slice %48 {offsets = [1, 0, 0], sizes = [1, 16, 128], strides = [1, 1, 1]} : vector<2x16x128xbf16> to vector<1x16x128xbf16>
    %67 = vector.shape_cast %66 : vector<1x16x128xbf16> to vector<16x128xbf16>
    %cst_29 = arith.constant 0.000000e+00 : bf16
    %68 = vector.broadcast %cst_29 : bf16 to vector<16x1xbf16>
    %69 = vector.extract_strided_slice %67 {offsets = [0, 0], sizes = [16, 127], strides = [1, 1]} : vector<16x128xbf16> to vector<16x127xbf16>
    %70 = tpu.concatenate %68, %69 in 1 : vector<16x1xbf16>, vector<16x127xbf16> -> vector<16x128xbf16>
    %71 = vector.extract_strided_slice %67 {offsets = [0, 1], sizes = [16, 127], strides = [1, 1]} : vector<16x128xbf16> to vector<16x127xbf16>
    %cst_30 = arith.constant 0.000000e+00 : bf16
    %72 = vector.broadcast %cst_30 : bf16 to vector<16x1xbf16>
    %73 = tpu.concatenate %71, %72 in 1 : vector<16x127xbf16>, vector<16x1xbf16> -> vector<16x128xbf16>
    %74 = tpu.concatenate %70, %67, %73 in 0 : vector<16x128xbf16>, vector<16x128xbf16>, vector<16x128xbf16> -> vector<48x128xbf16>
    %cst_31 = arith.constant dense<0.000000e+00> : vector<32x128xf32>
    %75 = tpu.matmul %49, %74, %cst_31 {dimension_numbers = #tpu.dot_dimension_numbers<[1], [0], [0], [1], [0, 0, 1, 1], [], []>} : vector<32x48xbf16>, vector<48x128xbf16>, vector<32x128xf32> -> vector<32x128xf32>
    %76 = vector.broadcast %50 : vector<32x1xf32> to vector<32x128xf32>
    %77 = arith.addf %75, %76 : vector<32x128xf32>
    %c1 = arith.constant 1 : index
    %c0_32 = arith.constant 0 : index
    %c0_33 = arith.constant 0 : index
    %78 = vector.load %arg7[%c1, %c0_32, %c0_33] : memref<2x32x128xf32, #tpu.memory_space<vmem>>, vector<1x32x128xf32>
    %79 = vector.shape_cast %78 : vector<1x32x128xf32> to vector<32x128xf32>
    %80 = vector.shape_cast %77 : vector<32x128xf32> to vector<1x32x128xf32>
    tpu.vector_store %arg7[%c1, %c0_32, %c0_33], %80 {strides = array<i32>} : memref<2x32x128xf32, #tpu.memory_space<vmem>>, vector<1x32x128xf32>,
    return
  }
  func.func @transform_0(%arg0: i32) -> (i32, i32, i32) {
    %c0_i32 = arith.constant 0 : i32
    %c0_i32_0 = arith.constant 0 : i32
    %c0_i32_1 = arith.constant 0 : i32
    return %arg0, %c0_i32, %c0_i32_0 : i32, i32, i32
  }
  func.func @transform_1(%arg0: i32) -> (i32, i32, i32) {
    %c0_i32 = arith.constant 0 : i32
    %c0_i32_0 = arith.constant 0 : i32
    %c0_i32_1 = arith.constant 0 : i32
    return %arg0, %c0_i32, %c0_i32_0 : i32, i32, i32
  }
  func.func @transform_2(%arg0: i32) -> (i32, i32) {
    %c0_i32 = arith.constant 0 : i32
    %c0_i32_0 = arith.constant 0 : i32
    %c0_i32_1 = arith.constant 0 : i32
    return %c0_i32, %c0_i32_0 : i32, i32
  }
  func.func @transform_3(%arg0: i32) -> (i32, i32) {
    %c0_i32 = arith.constant 0 : i32
    %c0_i32_0 = arith.constant 0 : i32
    %c0_i32_1 = arith.constant 0 : i32
    return %c0_i32, %c0_i32_0 : i32, i32
  }
  func.func @transform_4(%arg0: i32) -> (i32, i32) {
    %c0_i32 = arith.constant 0 : i32
    %c0_i32_0 = arith.constant 0 : i32
    %c0_i32_1 = arith.constant 0 : i32
    return %c0_i32, %c0_i32_0 : i32, i32
  }
  func.func @transform_5(%arg0: i32) -> (i32, i32) {
    %c0_i32 = arith.constant 0 : i32
    %c0_i32_0 = arith.constant 0 : i32
    %c0_i32_1 = arith.constant 0 : i32
    return %c0_i32, %c0_i32_0 : i32, i32
  }
  func.func @transform_6(%arg0: i32) -> (i32, i32, i32) {
    %c0_i32 = arith.constant 0 : i32
    %c0_i32_0 = arith.constant 0 : i32
    %c0_i32_1 = arith.constant 0 : i32
    return %arg0, %c0_i32, %c0_i32_0 : i32, i32, i32
  }
}

</mosaic_0001>

<bundles_post_ra>
// kernel: conv_block1d.1
= control target key start
LH: loop header
LB: loop body
LE: loop exit
PB: predicated region body
PF: predicated region fallthrough
CT: control target
= control target key end

     0   :  { %s990_s0 = inlined_call_operand.vmem [shape: f32[2,16,128], index: 0, kind: input, shape index: {}]   ;;  %s991_s1 = inlined_call_operand.vmem [shape: f32[2,2,16], index: 1, kind: input, shape index: {}]   ;;  %s992_s2 = inlined_call_operand.vmem [shape: f32[16,8], index: 2, kind: input, shape index: {}]   ;;  %s993_s3 = inlined_call_operand.vmem [shape: f32[8,16], index: 3, kind: input, shape index: {}]   ;;  %s994_s4 = inlined_call_operand.vmem [shape: bf16[32,48], index: 4, kind: input, shape index: {}]   ;;  %s995_s5 = inlined_call_operand.vmem [shape: f32[32,1], index: 5, kind: input, shape index: {}]   ;;  %s996_s6 = inlined_call_operand.hbm [shape: f32[2,32,128], index: 6, kind: output, shape index: {}]  }
   0x1   :  { %v882_v0 = vld [vmem:[%s990_s0 + $0x10] sm:$0xff]  ;;  %v887_v1 = vld [vmem:[%s990_s0] sm:$0xff]  ;;  %v894_v2 = vld [vmem:[%s990_s0 + $0x18] sm:$0xff] }
   0x2   :  { %36 = vadd.xlane.f32.xlu1 %v882_v0  ;;  %32 = vadd.xlane.f32.xlu0 %v887_v1  ;;  %v899_v3 = vld [vmem:[%s990_s0 + $0x8] sm:$0xff] }
   0x3   :  { %11 = vsyncpa [#allocation3], 0  ;;  %v41_v4 = vmul.f32 %v899_v3, %v899_v3  ;;  %v40_v5 = vmul.f32 %v887_v1, %v887_v1  ;;  %v43_v6 = vmul.f32 %v894_v2, %v894_v2  ;;  %v42_v7 = vmul.f32 %v882_v0, %v882_v0  ;;  %v30_v9 = vld [vmem:[%s992_s2 + $0x8] sm:$0xff]  ;;  %v29_v10 = vld [vmem:[%s992_s2] sm:$0xff]  ;;  %s838_s13 = smov 127   ;;  %s839_s14 = smov 1  }
   0x4   :  { %v836_v8 = vmov 0.0   ;;  %vm837_vm0 = vmmov 0   ;;  %v56_v11 = vlaneseq  ;;  %vm67_vm1 = vcmask 130112   ;;  %v31_v39 = vld [vmem:[%s993_s3] sm:$0xff] }
   0x5   :  { %738 = vmatprep.subr.mxu0 %v836_v8  ;;  %745 = vmatprep.subr.mxu1 %v836_v8  ;;  %vm78_vm2 = vcmask 1041409   ;;  %vm80_vm3 = vcmask 130048   ;;  %vm255_vm4 = vcmask 64512   ;;  %v403_v53 = vld [vmem:[%s991_s1 + $0x2] sm:$0x3]  ;;  %vm558_vm6 = vcmask 392192  }
   0x6   :  { %38 = vadd.xlane.f32.xlu1 %v894_v2  ;;  %34 = vadd.xlane.f32.xlu0 %v899_v3  ;;  %v927_v12 = vand.u32 127, %v56_v11  ;;  %v929_v13 = vshrl.u32 %v56_v11, 7  ;;  %v406_v54 = vrot.slane %v403_v53, 7  ;;  %v402_v55 = vld [vmem:[%s991_s1] sm:$0x3]  ;;  %vm524_vm7 = vcmask 1039360  }
   0x7   :  { %739 = vmatpush3.msra.mxu0 %v30_v9  ;;  %746 = vmatpush3.msra.mxu1 %v30_v9  ;;  %vm517_vm8 = vcmask 7168  }
   0x8   :  { %740 = vmatprep.subr.mxu0 %v836_v8  ;;  %747 = vmatprep.subr.mxu1 %v836_v8  ;;  %v62_v14 = vadd.s32 4294967288, %v927_v12  ;;  %v60_v17 = vsub.s32 %v927_v12, %v929_v13  ;;  %v407_v56 = vsel %vm78_vm2, %v406_v54, %v402_v55  ;;  %v419_v57 = vsub.s32 0, %v929_v13  ;;  %v512_v54 = vld [vmem:[%s995_s5 + $0x10] sm:$0xff]  ;;  %vm710_vm9 = vmneg %vm517_vm8 }
   0x9   :  { %741 = vmatpush3.msra.mxu0 %v29_v10  ;;  %742 = vmatprep.mubr.msk.f32.mxu0 %vm837_vm0, %v836_v8  ;;  %v430_v63 = vsub.s32 1, %v929_v13  ;;  %vm497_vm5 = vcmp.lt.s32.totalorder %v927_v12, 64 }
   0xa   :  { %46 = vadd.xlane.f32.xlu1 %v41_v4  ;;  %44 = vadd.xlane.f32.xlu0 %v40_v5  ;;  %v65_v18 = vsub.s32 %v62_v14, %v929_v13 }
   0xb   :  { %748 = vmatpush3.msra.mxu1 %v29_v10  ;;  %749 = vmatprep.mubr.msk.f32.mxu1 %vm837_vm0, %v836_v8 }
   0xc   :  { %752 = vmatprep.subr.mxu0 %v836_v8  ;;  %757 = vmatprep.subr.mxu1 %v836_v8 }
   0xe   :  { %50 = vadd.xlane.f32.xlu1 %v43_v6  ;;  %48 = vadd.xlane.f32.xlu0 %v42_v7 }
  0x8b   :  { %v37_v15 = vpop.xlane.xlu1 %36  ;;  %v33_v16 = vpop.xlane.xlu0 %32 }
  0x8c   :  { %v72_v21 = vrot.slane %v37_v15, %v60_v17  ;;  %v61_v22 = vrot.slane %v33_v16, %v60_v17 }
  0x8f   :  { %v39_v19 = vpop.xlane.xlu1 %38  ;;  %v35_v20 = vpop.xlane.xlu0 %34 }
  0x90   :  { %v76_v23 = vrot.slane %v39_v19, %v65_v18  ;;  %v66_v24 = vrot.slane %v35_v20, %v65_v18 }
  0x92   :  { %v77_v25 = vsel %vm67_vm1, %v76_v23, %v72_v21  ;;  %v68_v26 = vsel %vm67_vm1, %v66_v24, %v61_v22 }
  0x93   :  { %v47_v27 = vpop.xlane.xlu1 %46  ;;  %v45_v28 = vpop.xlane.xlu0 %44  ;;  %v79_v29 = vsel %vm78_vm2, %v77_v25, %v68_v26 }
  0x94   :  { %743 = vmatmul.mubr.msk.f32.vlgmr.msra.gmra.mxu0 %vm80_vm3, %v79_v29  ;;  %v165_v30 = vrot.slane %v47_v27, %v65_v18  ;;  %v161_v31 = vrot.slane %v45_v28, %v60_v17 }
  0x95   :  { %754 = vmatprep.mubr.msk.f32.mxu0 %vm837_vm0, %v836_v8  ;;  %753 = vmatpush3.msra.mxu0 %v31_v39 }
  0x96   :  { %v166_v36 = vsel %vm67_vm1, %v165_v30, %v161_v31 }
  0x97   :  { %v51_v32 = vpop.xlane.xlu1 %50  ;;  %v49_v33 = vpop.xlane.xlu0 %48 }
  0x98   :  { %v174_v34 = vrot.slane %v51_v32, %v65_v18  ;;  %v170_v35 = vrot.slane %v49_v33, %v60_v17 }
  0x9a   :  { %v175_v37 = vsel %vm67_vm1, %v174_v34, %v170_v35 }
  0x9b   :  { %v176_v38 = vsel %vm78_vm2, %v175_v37, %v166_v36 }
  0x9c   :  { %750 = vmatmul.mubr.msk.f32.vlgmr.msra.gmra.mxu1 %vm80_vm3, %v176_v38 }
  0x9d   :  { %759 = vmatprep.mubr.msk.f32.mxu1 %vm837_vm0, %v836_v8  ;;  %758 = vmatpush3.msra.mxu1 %v31_v39 }
 0x154   :  { %v149_v40 = vpop.f32.mrf.mxu0 }
 0x155   :  { %v153_v41 = vmul.f32 0.0078125, %v149_v40  ;;  %v707_v40 = vsel %vm497_vm5, 1.0, %v836_v8 }
 0x156   :  { %v744_v42 = vpop.f32.mrf.mxu0 }
 0x157   :  { %755 = vmatmul.mubr.msk.f32.vlgmr.msra.gmra.mxu0 %vm255_vm4, %v153_v41  ;;  %v250_v44 = vmul.f32 %v153_v41, %v153_v41 }
 0x15c   :  { %v245_v43 = vpop.f32.mrf.mxu1 }
 0x15d   :  { %v249_v45 = vmul.f32 0.0078125, %v245_v43 }
 0x15e   :  { %v751_v46 = vpop.f32.mrf.mxu1 }
 0x15f   :  { %v251_v47 = vsub.f32 %v249_v45, %v250_v44  ;;  %v794_v45 = vld [vmem:[%s994_s4] sm:$0xff]  }
 0x160   :  { %768 = vmatprep.mubr.msk.bf16.mxu0 %vm558_vm6, %v794_v45 }
 0x161   :  { %v252_v48 = vmax.f32 %v251_v47, 0.0 }
 0x163   :  { %v253_v49 = vadd.f32 1e-05, %v252_v48 }
 0x165   :  { %796 = vrsqrt.f32 %v253_v49 }
 0x172   :  { %v797_v50 = vpop.eup %796 }
 0x173   :  { %760 = vmatmul.mubr.msk.f32.vlgmr.msra.gmra.mxu1 %vm255_vm4, %v797_v50  ;;  %v840_v50 = vmov 0  }
 0x174   :  { %778 = vmatprep.mubr.msk.bf16.mxu1 %vm558_vm6, %v794_v45  ;;  %793 = vset.pattern.permute.xlu1 %v840_v50 }
 0x175   :  { %792 = vset.pattern.permute.xlu0 %v840_v50 }
 0x217   :  { %v325_v51 = vpop.f32.mrf.mxu0 }
 0x219   :  { %v756_v52 = vpop.f32.mrf.mxu0 }
 0x21a   :  { %v511_v52 = vld [vmem:[%s995_s5 + $0x8] sm:$0xff] }
 0x233   :  { %v398_v58 = vpop.f32.mrf.mxu1 }
 0x234   :  { %v409_v59 = vmul.f32 %v407_v56, %v398_v58 }
 0x235   :  { %v761_v60 = vpop.f32.mrf.mxu1 }
 0x236   :  { %v410_v61 = vmul.f32 %v409_v59, %v325_v51  ;;  %v420_v62 = vrot.slane %v409_v59, %v419_v57  ;;  %v431_v5 = vrot.slane %v409_v59, %v430_v63  ;;  %v510_v51 = vld [vmem:[%s995_s5] sm:$0xff]  ;;  %v795_v60 = vld [vmem:[%s994_s4 + $0x8] sm:$0xff]   ;;  %s841_s4 = smov [#allocation2]  }
 0x238   :  { %426 = vbcast.lane.b32.xlu1 %v420_v62, 264  ;;  %422 = vbcast.lane.b32.xlu0 %v420_v62, 256  ;;  %v412_v4 = vrot.slane %v410_v61, 7  ;;  %v416_v9 = vsub.f32 %v403_v53, %v410_v61  ;;  %v513_v53 = vld [vmem:[%s995_s5 + $0x18] sm:$0xff]  ;;  %s688_s5 = sshll.u32 %s841_s4, 4  ;;  %s689_s5 = int_to_ptr.vmem [resolvable:$true] %s688_s5 }
 0x239   :  { %s814_s25 = scalar_lea.vmem %s689_s5, 1024  ;;  %p819_p1 = scmp.lt.s32.totalorder %s689_s5, %s689_s5 }
 0x23a   :  { %v415_v6 = vsub.f32 %v402_v55, %v412_v4  ;;  %v457_v10 = vrot.slane %v416_v9, %v430_v63  ;;  %p815_p0 = scmp.ne.s32.totalorder %s689_s5, %s814_s25  ;;  %p820_p2 = scmp.lt.s32.totalorder %s814_s25, %s814_s25 }
 0x23c   :  { %433 = vbcast.lane.b32.xlu1 %v431_v5, 256  ;;  %v446_v7 = vrot.slane %v415_v6, %v430_v63  ;;  %p821_p3 = por %p820_p2, %p819_p1 }
 0x23e   :  { %448 = vbcast.lane.b32.xlu0 %v446_v7, 256  ;;  %p822_p4 = pnand %p821_p3, %p815_p0 }
 0x240   :  { %437 = vbcast.lane.b32.xlu1 %v431_v5, 264 }
 0x242   :  { %459 = vbcast.lane.b32.xlu0 %v457_v10, 256 }
 0x244   :  { %452 = vbcast.lane.b32.xlu1 %v446_v7, 264 }
 0x248   :  { %463 = vbcast.lane.b32.xlu1 %v457_v10, 264 }
 0x2aa   :  { %v427_v11 = vpop.permute.xlu1 %426  ;;  %v423_v14 = vpop.permute.xlu0 %422 }
 0x2ab   :  { %v439_v16 = vmul.f32 %v423_v14, %v887_v1  ;;  %v440_v22 = vmul.f32 %v427_v11, %v899_v3 }
 0x2ae   :  { %v434_v15 = vpop.permute.xlu1 %433 }
 0x2af   :  { %v441_v19 = vmul.f32 %v434_v15, %v882_v0 }
 0x2b0   :  { %v449_v13 = vpop.permute.xlu0 %448 }
 0x2b1   :  { %v465_v17 = vadd.f32 %v449_v13, %v439_v16 }
 0x2b2   :  { %v438_v18 = vpop.permute.xlu1 %437 }
 0x2b3   :  { %v703_v20 = vmul.f32 -1.442695, %v465_v17  ;;  %v442_v27 = vmul.f32 %v438_v18, %v894_v2 }
 0x2b4   :  { %v460_v21 = vpop.permute.xlu0 %459 }
 0x2b5   :  { %798 = vpow2.f32 %v703_v20  ;;  %v467_v23 = vadd.f32 %v460_v21, %v441_v19 }
 0x2b6   :  { %v453_v24 = vpop.permute.xlu1 %452 }
 0x2b7   :  { %v705_v25 = vmul.f32 -1.442695, %v467_v23  ;;  %v466_v26 = vadd.f32 %v453_v24, %v440_v22 }
 0x2b9   :  { %800 = vpow2.f32 %v705_v25  ;;  %v704_v28 = vmul.f32 -1.442695, %v466_v26 }
 0x2ba   :  { %v464_v29 = vpop.permute.xlu1 %463 }
 0x2bb   :  { %802 = vpow2.f32 %v704_v28  ;;  %v468_v1 = vadd.f32 %v464_v29, %v442_v27 }
 0x2bd   :  { %v706_v30 = vmul.f32 -1.442695, %v468_v1 }
 0x2bf   :  { %804 = vpow2.f32 %v706_v30 }
 0x2c2   :  { %v799_v31 = vpop.eup %798 }
 0x2c3   :  { %v481_v0 = vadd.f32 1.0, %v799_v31 }
 0x2c5   :  { %806 = vrcp.f32 %v481_v0 }
 0x2c6   :  { %v801_v32 = vpop.eup %800 }
 0x2c7   :  { %v483_v33 = vadd.f32 1.0, %v801_v32 }
 0x2c8   :  { %v803_v3 = vpop.eup %802 }
 0x2c9   :  { %v482_v34 = vadd.f32 1.0, %v803_v3  ;;  %808 = vrcp.f32 %v483_v33 }
 0x2cb   :  { %810 = vrcp.f32 %v482_v34 }
 0x2cc   :  { %v805_v35 = vpop.eup %804 }
 0x2cd   :  { %v484_v36 = vadd.f32 1.0, %v805_v35 }
 0x2cf   :  { %812 = vrcp.f32 %v484_v36 }
 0x2d2   :  { %v807_v2 = vpop.eup %806 }
 0x2d3   :  { %v493_v38 = vmul.f32 %v807_v2, %v465_v17 }
 0x2d5   :  { %v500_v42 = vmul.f32 %v707_v40, %v493_v38 }
 0x2d6   :  { %v809_v37 = vpop.eup %808 }
 0x2d7   :  { %v495_v43 = vmul.f32 %v809_v37, %v467_v23 }
 0x2d8   :  { %v811_v39 = vpop.eup %810 }
 0x2d9   :  { %v494_v41 = vmul.f32 %v811_v39, %v466_v26  ;;  %v502_v12 = vmul.f32 %v707_v40, %v495_v43 }
 0x2db   :  { %v501_v44 = vmul.f32 %v707_v40, %v494_v41 }
 0x2dc   :  { %v813_v46 = vpop.eup %812 }
 0x2dd   :  { %v504_v47 = vpack.c.bf16 %v501_v44, %v500_v42  ;;  %v496_v48 = vmul.f32 %v813_v46, %v468_v1 }
 0x2df   :  { %v503_v49 = vmul.f32 %v707_v40, %v496_v48  ;;  %522 = vrot.lane.b32.xlu0 %v504_v47, %s838_s13 }
 0x2e1   :  { %v505_v8 = vpack.c.bf16 %v503_v49, %v502_v12 }
 0x2e3   :  { %515 = vrot.lane.b32.xlu0 %v504_v47, %s839_s14  ;;  %624 = vrot.lane.b32.xlu1 %v505_v8, %s838_s13 }
 0x2e7   :  { %619 = vrot.lane.b32.xlu1 %v505_v8, %s839_s14  ;;  %530 = vperm.xlu0 %792, %v510_v51  }
 0x2eb   :  { %535 = vperm.xlu1 %793, %v511_v52   ;;  %545 = vperm.xlu0 %792, %v513_v53  }
 0x2ef   :  { %540 = vperm.xlu1 %793, %v512_v54  }
 0x351   :  { %v523_v55 = vpop.permute.xlu0 %522 }
 0x352   :  { %v526_v56 = vsel %vm524_vm7, %v523_v55, 0  ;;  %782 = vmatprep.subr.msk.bf16.mxu0 %vm524_vm7, %v523_v55 }
 0x353   :  { %763 = vmatpush3.bf16.msra.mxu0 %v526_v56 }
 0x354   :  { %764 = vmatprep.subr.bf16.mxu0 %v504_v47 }
 0x355   :  { %v625_v57 = vpop.permute.xlu1 %624  ;;  %v516_v59 = vpop.permute.xlu0 %515 }
 0x356   :  { %v627_v58 = vsel %vm524_vm7, %v625_v57, 0  ;;  %783 = vmatprep.subr.msk.bf16.mxu1 %vm524_vm7, %v625_v57 }
 0x357   :  { %765 = vmatpush3.bf16.msra.mxu0 %v504_v47  ;;  %773 = vmatpush3.bf16.msra.mxu1 %v627_v58 }
 0x358   :  { %766 = vmatprep.subr.msk.bf16.mxu0 %vm710_vm9, %v516_v59  ;;  %774 = vmatprep.subr.bf16.mxu1 %v505_v8 }
 0x359   :  { %v620_v61 = vpop.permute.xlu1 %619 }
 0x35b   :  { %767 = vmatpush3.bf16.msk.msra.mxu0 %vm710_vm9, %v516_v59  ;;  %775 = vmatpush3.bf16.msra.mxu1 %v505_v8 }
 0x35c   :  { %776 = vmatprep.subr.msk.bf16.mxu1 %vm710_vm9, %v620_v61 }
 0x35e   :  { %769 = vmatmul.mubr.msk.bf16.vlgmr.msra.gmra.mxu0 %vm558_vm6, %v795_v60 }
 0x35f   :  { %777 = vmatpush3.bf16.msk.msra.mxu1 %vm710_vm9, %v620_v61 }
 0x362   :  { %779 = vmatmul.mubr.msk.bf16.vlgmr.msra.gmra.mxu1 %vm558_vm6, %v795_v60  ;;  %v531_v63 = vpop.permute.xlu0 %530 }
 0x366   :  { %v536_v62 = vpop.permute.xlu1 %535  ;;  %v546_v9 = vpop.permute.xlu0 %545 }
 0x36a   :  { %v541_v4 = vpop.permute.xlu1 %540 }
 0x41e   :  { %v770_v5 = vpop.f32.mrf.mxu0 }
 0x41f   :  { %v608_v6 = vadd.f32 %v770_v5, %v541_v4 }
 0x420   :  { %v599_v7 = vpop.f32.mrf.mxu0 }
 0x421   :  { %v600_v10 = vadd.f32 %v599_v7, %v531_v63  ;;  %616 = vst [vmem:[#allocation2 + $0x10] sm:$0xff] %v608_v6 }
 0x422   :  { %v771_v11 = vpop.f32.mrf.mxu0  ;;  %v780_v14 = vpop.f32.mrf.mxu1 }
 0x423   :  { %614 = vst [vmem:[#allocation2] sm:$0xff] %v600_v10  ;;  %v611_v15 = vadd.f32 %v771_v11, %v546_v9  ;;  %v672_v16 = vadd.f32 %v780_v14, %v541_v4 }
 0x424   :  { %v602_v13 = vpop.f32.mrf.mxu0  ;;  %v663_v17 = vpop.f32.mrf.mxu1 }
 0x425   :  { %617 = vst [vmem:[#allocation2 + $0x18] sm:$0xff] %v611_v15  ;;  %681 = vst [vmem:[#allocation2 + $0x30] sm:$0xff] %v672_v16  ;;  %v603_v18 = vadd.f32 %v602_v13, %v536_v62  ;;  %v664_v19 = vadd.f32 %v663_v17, %v531_v63 }
 0x426   :  { %v781_v20 = vpop.f32.mrf.mxu1 }
 0x427   :  { %615 = vst [vmem:[#allocation2 + $0x8] sm:$0xff] %v603_v18  ;;  %679 = vst [vmem:[#allocation2 + $0x20] sm:$0xff] %v664_v19  ;;  %v675_v21 = vadd.f32 %v781_v20, %v546_v9 }
 0x428   :  { %v666_v22 = vpop.f32.mrf.mxu1 }
 0x429   :  { %682 = vst [vmem:[#allocation2 + $0x38] sm:$0xff] %v675_v21  ;;  %v667_v23 = vadd.f32 %v666_v22, %v536_v62 }
 0x42b   :  { %680 = vst [vmem:[#allocation2 + $0x28] sm:$0xff] %v667_v23 }
 0x42c   :  { %825 = shalt.err (!%p822_p4)
}
 0x42d   :  { %s842_s26 = smov 128   ;;  %s843_s27 = smov 8  }
 0x42e   :  { %694 = dma.vmem_to_hbm [thread:$0]  %s689_s5, 1024, %s996_s6, [#allocation3], %s842_s26, %s842_s26, %s843_s27  }
 0x42f   :  { %834 = dma.done.wait [#allocation3], 1024  }
 0x430   :  { %835 = vsyncadd [#allocation3], 4294966272 }
 0x431   :  { %698 = vsyncpa [#allocation3], 1 }

</bundles_post_ra>
